<compile_context>
chip_gen: v7x
topology: tpu7x:2x2x1
jax: 0.10.0
libtpu: 0.0.40
codegen_flags: <defaults>
</compile_context>

<pallas_src>
import math
import jax
import jax.numpy as jnp
from jax.experimental import pallas as pl
from jax.experimental.pallas import tpu as pltpu


def _ceil_to(x, m):
    return ((x + m - 1) // m) * m


def _choose_tile_b(B):
    """Row tile size.

    Big enough to amortize the ~0.35 us/grid-step overhead, but for mid/large
    B always >= 2 grid steps so the ("parallel",) row axis can shard across
    both v7x TensorCores.  VMEM stays tiny either way (<1.5 MB at tile=512).
    """
    if B <= 256:
        return _ceil_to(max(B, 1), 8)            # single step; tiny batch
    half = _ceil_to(-(-B // 2), 8)               # ceil(B/2), sublane-aligned
    return min(512, half)                        # <=512 rows/step, >=2 steps


# ---------------------------------------------------------------------------
# Pallas kernel: fused 3-layer MLP (node + partition heads), lane-dense output
# ---------------------------------------------------------------------------
def actor_kernel(
    bemb_ref,   # [TILE_B, node_dim]  boundary node embeddings
    w1_ref,     # [node_dim, 2H]      concat(ns_w1a, ps_w1a) along out dim
    b1_ref,     # [1, 2H]             effective bias (global context folded in)
    w2_ref,     # [2H, 2*h2]          block-diag(ns_w2, ps_w2)
    b2_ref,     # [1, 2*h2]
    w3_ref,     # [2*h2, OUT_PAD]     col 0 = node head, cols 1..1+P = partition head
    b3_ref,     # [1, OUT_PAD]
    out_ref,    # [TILE_B, OUT_PAD]
):
    f32 = jnp.float32
    h = jnp.dot(bemb_ref[...], w1_ref[...], preferred_element_type=f32) + b1_ref[...]
    h = jnp.maximum(h, 0.0)
    h = jnp.dot(h, w2_ref[...], preferred_element_type=f32) + b2_ref[...]
    h = jnp.maximum(h, 0.0)
    out = jnp.dot(h, w3_ref[...], preferred_element_type=f32) + b3_ref[...]
    out_ref[...] = out.astype(out_ref.dtype)


# ---------------------------------------------------------------------------
# Parameter construction (Xavier-uniform weights, zero biases) — deterministic
# Weights stored as [in_features, out_features] (transpose of torch layout).
# ---------------------------------------------------------------------------
def xavier_uniform(key, fan_in, fan_out):
    bound = math.sqrt(6.0 / (fan_in + fan_out))
    return jax.random.uniform(key, (fan_in, fan_out), jnp.float32, -bound, bound)


def make_params(key, node_dim, region_dim, num_partitions, hidden_dim):
    in_dim = node_dim + region_dim
    h2 = hidden_dim // 2
    keys = jax.random.split(key, 8)
    return {
        # node selector
        "ns_w1": xavier_uniform(keys[0], in_dim, hidden_dim),
        "ns_b1": jnp.zeros((1, hidden_dim), jnp.float32),
        "ns_w2": xavier_uniform(keys[1], hidden_dim, h2),
        "ns_b2": jnp.zeros((1, h2), jnp.float32),
        "ns_w3": xavier_uniform(keys[2], h2, 1),
        "ns_b3": jnp.zeros((1, 1), jnp.float32),
        # partition selector
        "ps_w1": xavier_uniform(keys[3], in_dim, hidden_dim),
        "ps_b1": jnp.zeros((1, hidden_dim), jnp.float32),
        "ps_w2": xavier_uniform(keys[4], hidden_dim, h2),
        "ps_b2": jnp.zeros((1, h2), jnp.float32),
        "ps_w3": xavier_uniform(keys[5], h2, num_partitions),
        "ps_b3": jnp.zeros((1, num_partitions), jnp.float32),
        # global encoder
        "ge_w1": xavier_uniform(keys[6], region_dim, hidden_dim),
        "ge_b1": jnp.zeros((1, hidden_dim), jnp.float32),
        "ge_w2": xavier_uniform(keys[7], hidden_dim, region_dim),
        "ge_b2": jnp.zeros((1, region_dim), jnp.float32),
    }


# ---------------------------------------------------------------------------
# One-time weight fusion (done once, outside the per-step forward)
# ---------------------------------------------------------------------------
def fuse_params(params, node_dim, num_partitions):
    H = params["ns_w1"].shape[1]
    h2 = params["ns_w2"].shape[1]
    P = num_partitions
    out_pad = _ceil_to(1 + P, 128)   # lane-dense output width

    # layer 1: split node vs. context rows; concat node parts along output dim
    ns_w1a, ns_w1b = params["ns_w1"][:node_dim], params["ns_w1"][node_dim:]
    ps_w1a, ps_w1b = params["ps_w1"][:node_dim], params["ps_w1"][node_dim:]
    w1 = jnp.concatenate([ns_w1a, ps_w1a], axis=1)                       # [node_dim, 2H]

    # layer 2: block-diagonal
    w2 = jnp.zeros((2 * H, 2 * h2), jnp.float32)
    w2 = w2.at[:H, :h2].set(params["ns_w2"]).at[H:, h2:].set(params["ps_w2"])
    b2 = jnp.concatenate([params["ns_b2"], params["ps_b2"]], axis=1)     # [1, 2*h2]

    # layer 3: column-packed, zero-padded to 128 lanes
    w3 = jnp.zeros((2 * h2, out_pad), jnp.float32)
    w3 = w3.at[:h2, 0:1].set(params["ns_w3"]).at[h2:, 1:1 + P].set(params["ps_w3"])
    b3 = jnp.zeros((1, out_pad), jnp.float32)
    b3 = b3.at[0, 0:1].set(params["ns_b3"][0]).at[0, 1:1 + P].set(params["ps_b3"][0])

    return {
        "w1": w1, "w2": w2, "b2": b2, "w3": w3, "b3": b3,
        # kept for folding the global context into the effective layer-1 bias
        "ns_w1b": ns_w1b, "ps_w1b": ps_w1b,
        "ns_b1": params["ns_b1"], "ps_b1": params["ps_b1"],
        "ge_w1": params["ge_w1"], "ge_b1": params["ge_b1"],
        "ge_w2": params["ge_w2"], "ge_b2": params["ge_b2"],
    }


# ---------------------------------------------------------------------------
# Wrapper (fully jitted): gather + tiny global encoder folded into bias,
# pallas_call, output slice + partition masking.
# ---------------------------------------------------------------------------
def actor_forward(fused, node_embeddings, region_embeddings, boundary_nodes, action_mask):
    P = action_mask.shape[1]            # static under jit
    out_pad = fused["w3"].shape[1]
    node_dim = node_embeddings.shape[1]
    B = boundary_nodes.shape[0]

    # M=1 global encoder, folded into the fused layer-1 bias
    r_mean = jnp.mean(region_embeddings, axis=0, keepdims=True)               # [1, R]
    g = jnp.maximum(r_mean @ fused["ge_w1"] + fused["ge_b1"], 0.0)
    g = g @ fused["ge_w2"] + fused["ge_b2"]                                   # [1, R]
    b1 = jnp.concatenate(
        [g @ fused["ns_w1b"] + fused["ns_b1"],
         g @ fused["ps_w1b"] + fused["ps_b1"]], axis=1)                       # [1, 2H]

    tile_b = _choose_tile_b(B)
    Bp = _ceil_to(max(B, 1), tile_b)

    # Pad the *index* vector, not the gathered activations: the gather then
    # produces the padded [Bp, node_dim] array directly (no extra pad copy).
    bn_padded = jnp.pad(boundary_nodes, (0, Bp - B))
    bemb = node_embeddings[bn_padded].astype(jnp.float32)                     # [Bp, node_dim]

    grid = (Bp // tile_b,)
    row_spec = lambda shape: pl.BlockSpec(shape, lambda i: (i, 0))
    full_spec = lambda arr: pl.BlockSpec(arr.shape, lambda i: (0, 0))

    out = pl.pallas_call(
        actor_kernel,
        out_shape=jax.ShapeDtypeStruct((Bp, out_pad), jnp.float32),
        grid=grid,
        in_specs=[
            row_spec((tile_b, node_dim)),        # boundary embeddings (tiled over rows)
            full_spec(fused["w1"]), full_spec(b1),
            full_spec(fused["w2"]), full_spec(fused["b2"]),
            full_spec(fused["w3"]), full_spec(fused["b3"]),
        ],
        out_specs=row_spec((tile_b, out_pad)),
        compiler_params=pltpu.CompilerParams(dimension_semantics=("parallel",)),
    )(bemb, fused["w1"], b1, fused["w2"], fused["b2"], fused["w3"], fused["b3"])

    node_logits = out[:B, 0]
    partition_logits = out[:B, 1:1 + P]

    # masked_fill(~mask, -1e9) moved out of the kernel: on the sliced [B, P]
    # slab it is free, and it removed a [Bp, 128] f32 mask operand from HBM.
    bmask = action_mask[boundary_nodes]
    partition_logits = jnp.where(bmask, partition_logits, jnp.float32(-1e9))
    return node_logits, partition_logits


actor_forward_jit = jax.jit(actor_forward)


# ---------------------------------------------------------------------------
# Pure-JAX reference (mirrors the PyTorch forward, eval mode)
# ---------------------------------------------------------------------------
def actor_forward_ref(params, node_embeddings, region_embeddings, boundary_nodes,
                      action_mask):
    relu = lambda x: jnp.maximum(x, 0.0)
    r_mean = region_embeddings.mean(axis=0, keepdims=True)
    g = relu(r_mean @ params["ge_w1"] + params["ge_b1"]) @ params["ge_w2"] + params["ge_b2"]
    B = boundary_nodes.shape[0]
    ctx = jnp.broadcast_to(g, (B, g.shape[1]))
    bemb = node_embeddings[boundary_nodes]
    feat = jnp.concatenate([bemb, ctx], axis=1)

    h = relu(feat @ params["ns_w1"] + params["ns_b1"])
    h = relu(h @ params["ns_w2"] + params["ns_b2"])
    node_logits = (h @ params["ns_w3"] + params["ns_b3"])[:, 0]

    h = relu(feat @ params["ps_w1"] + params["ps_b1"])
    h = relu(h @ params["ps_w2"] + params["ps_b2"])
    part_logits = h @ params["ps_w3"] + params["ps_b3"]

    bmask = action_mask[boundary_nodes]
    part_logits = jnp.where(bmask, part_logits, -1e9)
    return node_logits, part_logits


if __name__ == "__main__":
    # small shapes consistent with the module's forward
    node_dim = 48
    region_dim = 16
    num_partitions = 4
    hidden_dim = 32
    total_nodes = 16
    num_boundary = 8

    key = jax.random.PRNGKey(0)
    k_par, k_node, k_region, k_mask = jax.random.split(key, 4)

    params = make_params(k_par, node_dim, region_dim, num_partitions, hidden_dim)
    fused = fuse_params(params, node_dim, num_partitions)

    node_embeddings = jax.random.normal(k_node, (total_nodes, node_dim), jnp.float32)
    region_embeddings = jax.random.normal(k_region, (num_partitions, region_dim), jnp.float32)
    boundary_nodes = jnp.array([0, 2, 3, 5, 7, 8, 11, 14], dtype=jnp.int32)
    action_mask = jax.random.bernoulli(k_mask, 0.7, (total_nodes, num_partitions))

    node_logits, partition_logits = actor_forward_jit(
        fused, node_embeddings, region_embeddings, boundary_nodes, action_mask
    )
    jax.block_until_ready((node_logits, partition_logits))

    # verify against a pure-JAX reference of the PyTorch forward
    ref_nl, ref_pl = actor_forward_ref(
        params, node_embeddings, region_embeddings, boundary_nodes, action_mask
    )
    assert node_logits.shape == (num_boundary,)
    assert partition_logits.shape == (num_boundary, num_partitions)
    assert jnp.allclose(node_logits, ref_nl, atol=1e-4, rtol=1e-4)
    assert jnp.allclose(partition_logits, ref_pl, atol=1e-4, rtol=1e-4)

    print("KERNEL_OK")
</pallas_src>

<mosaic_0001>
module attributes {stable_mosaic.version = 11 : i64} {
  func.func @actor_kernel(%arg0: i32, %arg1: memref<8x48xf32, #tpu.memory_space<vmem>>, %arg2: memref<48x64xf32, #tpu.memory_space<vmem>>, %arg3: memref<1x64xf32, #tpu.memory_space<vmem>>, %arg4: memref<64x32xf32, #tpu.memory_space<vmem>>, %arg5: memref<1x32xf32, #tpu.memory_space<vmem>>, %arg6: memref<32x128xf32, #tpu.memory_space<vmem>>, %arg7: memref<1x128xf32, #tpu.memory_space<vmem>>, %arg8: memref<8x128xf32, #tpu.memory_space<vmem>>) attributes {dimension_semantics = [#tpu.dimension_semantics<parallel>], iteration_bounds = array<i64: 1>, scalar_prefetch = 0 : i64, scratch_operands = 0 : i64, tpu.core_type = #tpu.core_type<tc>, window_params = [{transform_indices = @transform_0, window_bounds = array<i64: 8, 48>}, {pipeline_mode = #tpu.pipeline_mode<synchronous>, transform_indices = @transform_1, window_bounds = array<i64: 48, 64>}, {pipeline_mode = #tpu.pipeline_mode<synchronous>, transform_indices = @transform_2, window_bounds = array<i64: 1, 64>}, {pipeline_mode = #tpu.pipeline_mode<synchronous>, transform_indices = @transform_3, window_bounds = array<i64: 64, 32>}, {pipeline_mode = #tpu.pipeline_mode<synchronous>, transform_indices = @transform_4, window_bounds = array<i64: 1, 32>}, {pipeline_mode = #tpu.pipeline_mode<synchronous>, transform_indices = @transform_5, window_bounds = array<i64: 32, 128>}, {pipeline_mode = #tpu.pipeline_mode<synchronous>, transform_indices = @transform_6, window_bounds = array<i64: 1, 128>}, {transform_indices = @transform_7, window_bounds = array<i64: 8, 128>}]} {
    %c0 = arith.constant 0 : index
    %c0_0 = arith.constant 0 : index
    %0 = vector.load %arg1[%c0, %c0_0] : memref<8x48xf32, #tpu.memory_space<vmem>>, vector<8x48xf32>
    %c0_1 = arith.constant 0 : index
    %c0_2 = arith.constant 0 : index
    %1 = vector.load %arg2[%c0_1, %c0_2] : memref<48x64xf32, #tpu.memory_space<vmem>>, vector<48x64xf32>
    %cst = arith.constant dense<0.000000e+00> : vector<8x64xf32>
    %2 = tpu.matmul %0, %1, %cst {dimension_numbers = #tpu.dot_dimension_numbers<[1], [0], [0], [1], [0, 0, 1, 1], [], []>} : vector<8x48xf32>, vector<48x64xf32>, vector<8x64xf32> -> vector<8x64xf32>
    %c0_3 = arith.constant 0 : index
    %c0_4 = arith.constant 0 : index
    %3 = vector.load %arg3[%c0_3, %c0_4] : memref<1x64xf32, #tpu.memory_space<vmem>>, vector<1x64xf32>
    %4 = vector.broadcast %3 : vector<1x64xf32> to vector<8x64xf32>
    %5 = arith.addf %2, %4 : vector<8x64xf32>
    %cst_5 = arith.constant 0.000000e+00 : f32
    %6 = vector.broadcast %cst_5 : f32 to vector<8x64xf32>
    %7 = arith.maximumf %5, %6 : vector<8x64xf32>
    %c0_6 = arith.constant 0 : index
    %c0_7 = arith.constant 0 : index
    %8 = vector.load %arg4[%c0_6, %c0_7] : memref<64x32xf32, #tpu.memory_space<vmem>>, vector<64x32xf32>
    %cst_8 = arith.constant dense<0.000000e+00> : vector<8x32xf32>
    %9 = tpu.matmul %7, %8, %cst_8 {dimension_numbers = #tpu.dot_dimension_numbers<[1], [0], [0], [1], [0, 0, 1, 1], [], []>} : vector<8x64xf32>, vector<64x32xf32>, vector<8x32xf32> -> vector<8x32xf32>
    %c0_9 = arith.constant 0 : index
    %c0_10 = arith.constant 0 : index
    %10 = vector.load %arg5[%c0_9, %c0_10] : memref<1x32xf32, #tpu.memory_space<vmem>>, vector<1x32xf32>
    %11 = vector.broadcast %10 : vector<1x32xf32> to vector<8x32xf32>
    %12 = arith.addf %9, %11 : vector<8x32xf32>
    %cst_11 = arith.constant 0.000000e+00 : f32
    %13 = vector.broadcast %cst_11 : f32 to vector<8x32xf32>
    %14 = arith.maximumf %12, %13 : vector<8x32xf32>
    %c0_12 = arith.constant 0 : index
    %c0_13 = arith.constant 0 : index
    %15 = vector.load %arg6[%c0_12, %c0_13] : memref<32x128xf32, #tpu.memory_space<vmem>>, vector<32x128xf32>
    %cst_14 = arith.constant dense<0.000000e+00> : vector<8x128xf32>
    %16 = tpu.matmul %14, %15, %cst_14 {dimension_numbers = #tpu.dot_dimension_numbers<[1], [0], [0], [1], [0, 0, 1, 1], [], []>} : vector<8x32xf32>, vector<32x128xf32>, vector<8x128xf32> -> vector<8x128xf32>
    %c0_15 = arith.constant 0 : index
    %c0_16 = arith.constant 0 : index
    %17 = vector.load %arg7[%c0_15, %c0_16] : memref<1x128xf32, #tpu.memory_space<vmem>>, vector<1x128xf32>
    %18 = vector.broadcast %17 : vector<1x128xf32> to vector<8x128xf32>
    %19 = arith.addf %16, %18 : vector<8x128xf32>
    %c0_17 = arith.constant 0 : index
    %c0_18 = arith.constant 0 : index
    %20 = vector.load %arg8[%c0_17, %c0_18] : memref<8x128xf32, #tpu.memory_space<vmem>>, vector<8x128xf32>
    tpu.vector_store %arg8[%c0_17, %c0_18], %19 {strides = array<i32>} : memref<8x128xf32, #tpu.memory_space<vmem>>, vector<8x128xf32>,
    return
  }
  func.func @transform_0(%arg0: i32) -> (i32, i32) {
    %c0_i32 = arith.constant 0 : i32
    %c0_i32_0 = arith.constant 0 : i32
    return %arg0, %c0_i32 : i32, i32
  }
  func.func @transform_1(%arg0: i32) -> (i32, i32) {
    %c0_i32 = arith.constant 0 : i32
    %c0_i32_0 = arith.constant 0 : i32
    %c0_i32_1 = arith.constant 0 : i32
    return %c0_i32, %c0_i32_0 : i32, i32
  }
  func.func @transform_2(%arg0: i32) -> (i32, i32) {
    %c0_i32 = arith.constant 0 : i32
    %c0_i32_0 = arith.constant 0 : i32
    %c0_i32_1 = arith.constant 0 : i32
    return %c0_i32, %c0_i32_0 : i32, i32
  }
  func.func @transform_3(%arg0: i32) -> (i32, i32) {
    %c0_i32 = arith.constant 0 : i32
    %c0_i32_0 = arith.constant 0 : i32
    %c0_i32_1 = arith.constant 0 : i32
    return %c0_i32, %c0_i32_0 : i32, i32
  }
  func.func @transform_4(%arg0: i32) -> (i32, i32) {
    %c0_i32 = arith.constant 0 : i32
    %c0_i32_0 = arith.constant 0 : i32
    %c0_i32_1 = arith.constant 0 : i32
    return %c0_i32, %c0_i32_0 : i32, i32
  }
  func.func @transform_5(%arg0: i32) -> (i32, i32) {
    %c0_i32 = arith.constant 0 : i32
    %c0_i32_0 = arith.constant 0 : i32
    %c0_i32_1 = arith.constant 0 : i32
    return %c0_i32, %c0_i32_0 : i32, i32
  }
  func.func @transform_6(%arg0: i32) -> (i32, i32) {
    %c0_i32 = arith.constant 0 : i32
    %c0_i32_0 = arith.constant 0 : i32
    %c0_i32_1 = arith.constant 0 : i32
    return %c0_i32, %c0_i32_0 : i32, i32
  }
  func.func @transform_7(%arg0: i32) -> (i32, i32) {
    %c0_i32 = arith.constant 0 : i32
    %c0_i32_0 = arith.constant 0 : i32
    return %arg0, %c0_i32 : i32, i32
  }
}

</mosaic_0001>

<bundles_post_ra>
// kernel: actor_forward.1
= control target key start
LH: loop header
LB: loop body
LE: loop exit
PB: predicated region body
PF: predicated region fallthrough
CT: control target
= control target key end

     0   :  { %v397_v0 = vmov 0.0|0.0   ;;  %vm398_vm0 = vmmov 0   ;;  %v399_v4 = vmov 0.0   ;;  %vm40_vm1 = vcmask 392192   ;;  %s512_s1 = inlined_call_operand.vmem [shape: f32[48,64], index: 1, kind: input, shape index: {}]   ;;  %s513_s3 = inlined_call_operand.vmem [shape: f32[64,32], index: 3, kind: input, shape index: {}]   ;;  %s514_s0 = inlined_call_operand.vmem [shape: f32[8,48], index: 0, kind: input, shape index: {}]   ;;  %s515_s5 = inlined_call_operand.vmem [shape: f32[32,128], index: 5, kind: input, shape index: {}]   ;;  %s516_s2 = inlined_call_operand.vmem [shape: f32[1,64], index: 2, kind: input, shape index: {}]   ;;  %s517_s4 = inlined_call_operand.vmem [shape: f32[1,32], index: 4, kind: input, shape index: {}]   ;;  %s518_s6 = inlined_call_operand.vmem [shape: f32[1,128], index: 6, kind: input, shape index: {}]   ;;  %s519_s7 = inlined_call_operand.vmem [shape: f32[8,128], index: 7, kind: output, shape index: {}]  }
   0x1   :  { %367 = vmatprep.subr.bf16.mxu0 %v397_v0  ;;  %v27_v1 = vld [vmem:[%s512_s1] sm:$0xff]  ;;  %v28_v2 = vld [vmem:[%s512_s1 + $0x8] sm:$0xff]  ;;  %v29_v3 = vld [vmem:[%s512_s1 + $0x10] sm:$0xff]  ;;  %334 = vmatprep.mubr.msk.f32.mxu0 %vm398_vm0, %v399_v4  ;;  %vm130_vm2 = vcmask 523264   ;;  %vm216_vm3 = vcmask 261120  }
   0x2   :  { %v368_v5 = vpack.c.bf16 %v28_v2, %v27_v1  ;;  %v30_v6 = vld [vmem:[%s512_s1 + $0x18] sm:$0xff]  ;;  %376 = vmatprep.subr.bf16.mxu1 %v397_v0  ;;  %353 = vmatprep.mubr.msk.f32.mxu1 %vm398_vm0, %v399_v4  ;;  %v115_v7 = vld [vmem:[%s513_s3] sm:$0xff]  ;;  %v116_v8 = vld [vmem:[%s513_s3 + $0x8] sm:$0xff] }
   0x3   :  { %v371_v9 = vpack.c.bf16 %v30_v6, %v29_v3  ;;  %v377_v10 = vpack.c.bf16 %v116_v8, %v115_v7  ;;  %v117_v11 = vld [vmem:[%s513_s3 + $0x10] sm:$0xff]  ;;  %v118_v12 = vld [vmem:[%s513_s3 + $0x18] sm:$0xff]  ;;  %v31_v13 = vld [vmem:[%s512_s1 + $0x20] sm:$0xff] }
   0x4   :  { %369 = vmatpush3.bf16.msra.mxu0 %v368_v5  ;;  %v32_v14 = vld [vmem:[%s512_s1 + $0x28] sm:$0xff]  ;;  %v380_v15 = vpack.c.bf16 %v118_v12, %v117_v11  ;;  %v119_v16 = vld [vmem:[%s513_s3 + $0x20] sm:$0xff]  ;;  %v121_v21 = vld [vmem:[%s513_s3 + $0x30] sm:$0xff] }
   0x5   :  { %370 = vmatprep.subr.bf16.mxu0 %v397_v0  ;;  %378 = vmatpush3.bf16.msra.mxu1 %v377_v10  ;;  %v120_v17 = vld [vmem:[%s513_s3 + $0x28] sm:$0xff]  ;;  %v374_v18 = vpack.c.bf16 %v32_v14, %v31_v13  ;;  %v26_v20 = vld [vmem:[%s514_s0] sm:$0xff]  ;;  %v122_v22 = vld [vmem:[%s513_s3 + $0x38] sm:$0xff] }
   0x6   :  { %379 = vmatprep.subr.bf16.mxu1 %v397_v0  ;;  %v383_v19 = vpack.c.bf16 %v120_v17, %v119_v16  ;;  %v386_v23 = vpack.c.bf16 %v122_v22, %v121_v21  ;;  %v205_v24 = vld [vmem:[%s515_s5] sm:$0xff]  ;;  %v206_v25 = vld [vmem:[%s515_s5 + $0x8] sm:$0xff]  ;;  %v207_v32 = vld [vmem:[%s515_s5 + $0x10] sm:$0xff] }
   0x7   :  { %v389_v26 = vpack.c.bf16 %v206_v25, %v205_v24  ;;  %v295_v27 = vld [vmem:[%s516_s2] ss:$0 sm:$0xff]  ;;  %v208_v33 = vld [vmem:[%s515_s5 + $0x18] sm:$0xff] }
   0x8   :  { %372 = vmatpush3.bf16.msra.mxu0 %v371_v9  ;;  %v392_v34 = vpack.c.bf16 %v208_v33, %v207_v32  ;;  %v297_v35 = vld [vmem:[%s517_s4] ss:$0 sm:$0xff] }
   0x9   :  { %373 = vmatprep.subr.bf16.mxu0 %v397_v0  ;;  %381 = vmatpush3.bf16.msra.mxu1 %v380_v15  ;;  %v299_v40 = vld [vmem:[%s518_s6] ss:$0 sm:$0xff] }
   0xa   :  { %382 = vmatprep.subr.bf16.mxu1 %v397_v0 }
   0xc   :  { %375 = vmatpush3.bf16.msra.mxu0 %v374_v18 }
   0xd   :  { %388 = vmatprep.subr.bf16.mxu0 %v397_v0  ;;  %384 = vmatpush3.bf16.msra.mxu1 %v383_v19 }
   0xe   :  { %385 = vmatprep.subr.bf16.mxu1 %v397_v0 }
   0xf   :  { %335 = vmatmul.mubr.msk.f32.vlgmr.msra.gmra.mrb[0].mxu0 %vm40_vm1, %v26_v20 }
  0x10   :  { %364 = vmatprep.mubr.msk.f32.mxu0 %vm398_vm0, %v399_v4  ;;  %390 = vmatpush3.bf16.msra.mxu0 %v389_v26 }
  0x11   :  { %387 = vmatpush3.bf16.msra.mxu1 %v386_v23  ;;  %391 = vmatprep.subr.bf16.mxu0 %v397_v0 }
  0x14   :  { %393 = vmatpush3.bf16.msra.mxu0 %v392_v34 }
  0xe2   :  { %v110_v28 = vpop.f32.mrb[0].mxu0 }
  0xe3   :  { %v111_v29 = vadd.f32 %v295_v27, %v110_v28  ;;  %v336_v30 = vpop.f32.mrb[1].mxu0 }
  0xe5   :  { %v114_v31 = vmax.f32 %v111_v29, 0.0 }
  0xe7   :  { %354 = vmatmul.mubr.msk.f32.vlgmr.msra.gmra.mrb[0].mxu1 %vm130_vm2, %v114_v31 }
 0x1ba   :  { %v200_v36 = vpop.f32.mrb[0].mxu1 }
 0x1bb   :  { %v201_v37 = vadd.f32 %v297_v35, %v200_v36  ;;  %v355_v38 = vpop.f32.mrb[1].mxu1 }
 0x1bd   :  { %v204_v39 = vmax.f32 %v201_v37, 0.0 }
 0x1bf   :  { %365 = vmatmul.mubr.msk.f32.vlgmr.msra.gmra.mrb[2].mxu0 %vm216_vm3, %v204_v39 }
 0x292   :  { %v286_v41 = vpop.f32.mrb[2].mxu0 }
 0x293   :  { %v287_v42 = vadd.f32 %v299_v40, %v286_v41  ;;  %v366_v43 = vpop.f32.mrb[3].mxu0 }
 0x295   :  { %290 = vst [vmem:[%s519_s7] sm:$0xff] %v287_v42 }

</bundles_post_ra>
